<compile_context>
chip_gen: v6e
topology: v6e:2x2x1
jax: 0.10.0
libtpu: 0.0.40
codegen_flags: <defaults>
</compile_context>

<pallas_src>
import math

import jax
import jax.numpy as jnp
from jax.experimental import pallas as pl
from jax.experimental.pallas import tpu as pltpu


def _round_up(x, m):
    return ((x + m - 1) // m) * m


def _mlp_offset_kernel(x_ref, lc_ref, w1_ref, b1_ref, w2_ref, b2_ref,
                       w3_ref, b3_ref, out_ref):
    cdt = w1_ref.dtype                                    # compute (MXU feed) dtype

    x = x_ref[...].astype(cdt)                            # (TM, d)

    # layer 1: (TM, d) @ (d, 2d) + b1 -> ReLU   (f32 accumulate + f32 epilogue)
    h1 = jnp.dot(x, w1_ref[...], preferred_element_type=jnp.float32)
    h1 = jnp.maximum(h1 + b1_ref[...], 0.0)

    # layer 2: (TM, 2d) @ (2d, d) + b2 -> ReLU
    h2 = jnp.dot(h1.astype(cdt), w2_ref[...], preferred_element_type=jnp.float32)
    h2 = jnp.maximum(h2 + b2_ref[...], 0.0)

    # layer 3: (TM, d) @ (d, out_size) + b3, fused last_coords add
    o = jnp.dot(h2.astype(cdt), w3_ref[...], preferred_element_type=jnp.float32)
    o = o + b3_ref[...] + lc_ref[...].astype(jnp.float32)

    out_ref[...] = o.astype(out_ref.dtype)                # (TM, out_size)


def _vmem_capacity_bytes():
    try:
        return int(pltpu.get_tpu_info().vmem_capacity_bytes)
    except Exception:
        return 64 * 1024 * 1024                           # conservative (v7x per-TC)


def _vmem_bytes(tm, d, d2, out, *, x_bytes, w_bytes, lc_per_row):
    """Conservative VMEM estimate (lane/sublane padding + double buffering)."""
    tm_p = _round_up(max(tm, 8), 8)
    d_p, d2_p, out_p = (_round_up(n, 128) for n in (d, d2, out))
    lc_rows = tm_p if lc_per_row else 8
    # double-buffered streamed tiles: x in, last_coords in, out
    tiles = 2 * (tm_p * d_p * x_bytes + lc_rows * out_p * 4 + tm_p * out_p * 4)
    # resident weights/biases (double-buffered by the default pipeline)
    weights = 2 * ((d_p * d2_p + d2_p * d_p + d_p * out_p) * w_bytes
                   + 8 * (d2_p + d_p + out_p) * 4)
    # live intermediates: f32 h1/h2/o plus bf16 copies fed to the MXU
    interm = tm_p * (d2_p + d_p + out_p) * 4 + tm_p * (2 * d_p + d2_p) * w_bytes
    return tiles + weights + interm


def cascade_offset_generator(x, last_coords, params, *, tile_m=1024,
                             compute_dtype=jnp.bfloat16):
    """x: (..., d_model), last_coords: (..., out_size//2, 2) -> coords."""
    w1, b1, w2, b2, w3, b3 = params                       # weights stored (in, out)
    *lead, d = x.shape
    d2 = w1.shape[1]
    out_size = w3.shape[1]
    M = math.prod(lead)

    x2 = x.reshape(M, d)

    # last_coords: per-row stream if it matches the leading dims, otherwise a
    # single shared (1, out_size) block added (broadcast) inside the kernel.
    if last_coords.shape == (*lead, out_size // 2, 2):
        lc2 = last_coords.reshape(M, out_size)
        lc_per_row = True
    elif (math.prod(last_coords.shape) == out_size
          and last_coords.shape[-2:] == (out_size // 2, 2)):
        lc2 = last_coords.reshape(1, out_size)
        lc_per_row = False
    else:  # rare/odd broadcast pattern: fall back to materializing it
        lc2 = jnp.broadcast_to(
            last_coords, (*lead, out_size // 2, 2)).reshape(M, out_size)
        lc_per_row = True

    # bf16 MXU feed for weights; biases stay f32 (f32 epilogue).
    w1c = w1.astype(compute_dtype)
    w2c = w2.astype(compute_dtype)
    w3c = w3.astype(compute_dtype)
    b1r = b1.astype(jnp.float32).reshape(1, d2)
    b2r = b2.astype(jnp.float32).reshape(1, d)
    b3r = b3.astype(jnp.float32).reshape(1, out_size)

    x_bytes = jnp.dtype(x.dtype).itemsize
    w_bytes = jnp.dtype(compute_dtype).itemsize
    lc_bytes = jnp.dtype(lc2.dtype).itemsize

    # --- VMEM budget & row-tile selection ------------------------------------
    phys_vmem = _vmem_capacity_bytes()
    vmem_limit = max(32 * 1024 * 1024, min((phys_vmem * 3) // 4, 96 * 1024 * 1024))
    budget = vmem_limit - 6 * 1024 * 1024

    tm = min(tile_m, M)
    if tm < M:
        tm = max(8, (tm // 8) * 8)
    while tm > 8 and _vmem_bytes(tm, d, d2, out_size, x_bytes=x_bytes,
                                 w_bytes=w_bytes, lc_per_row=lc_per_row) > budget:
        tm = max(8, ((tm // 2) // 8) * 8)
    # >= 2 balanced grid steps when there is enough work (megacore sharding)
    if M >= 512 and pl.cdiv(M, tm) < 2:
        tm = _round_up((M + 1) // 2, 8)

    grid = (pl.cdiv(M, tm),)

    # advisory cost estimate with real (unpadded) dims and bf16 weight feed
    flops = 2 * M * (d * d2 + d2 * d + d * out_size)
    bytes_accessed = (M * d * x_bytes + lc2.size * lc_bytes
                      + M * out_size * x_bytes
                      + (d * d2 + d2 * d + d * out_size) * w_bytes
                      + (d2 + d + out_size) * 4)

    if lc_per_row:
        lc_spec = pl.BlockSpec((tm, out_size), lambda i: (i, 0))
    else:
        lc_spec = pl.BlockSpec((1, out_size), lambda i: (0, 0))

    out = pl.pallas_call(
        _mlp_offset_kernel,
        out_shape=jax.ShapeDtypeStruct((M, out_size), x.dtype),
        grid_spec=pltpu.PrefetchScalarGridSpec(
            num_scalar_prefetch=0,
            grid=grid,
            in_specs=[
                pl.BlockSpec((tm, d), lambda i: (i, 0)),          # x rows
                lc_spec,                                          # last_coords
                pl.BlockSpec((d, d2), lambda i: (0, 0)),          # w1 (resident)
                pl.BlockSpec((1, d2), lambda i: (0, 0)),          # b1
                pl.BlockSpec((d2, d), lambda i: (0, 0)),          # w2
                pl.BlockSpec((1, d), lambda i: (0, 0)),           # b2
                pl.BlockSpec((d, out_size), lambda i: (0, 0)),    # w3
                pl.BlockSpec((1, out_size), lambda i: (0, 0)),    # b3
            ],
            out_specs=pl.BlockSpec((tm, out_size), lambda i: (i, 0)),
        ),
        compiler_params=pltpu.CompilerParams(
            dimension_semantics=("parallel",),
            vmem_limit_bytes=vmem_limit),
        cost_estimate=pl.CostEstimate(
            flops=flops, transcendentals=0, bytes_accessed=bytes_accessed),
    )(x2, lc2, w1c, b1r, w2c, b2r, w3c, b3r)

    return out.reshape(*lead, out_size // 2, 2)


def init_params(key, d_model, out_size):
    """Deterministic PyTorch-style (uniform +-1/sqrt(fan_in)) init, (in,out)."""
    d2 = d_model * 2
    ks = jax.random.split(key, 6)

    def lin(kw, kb, fan_in, fan_out):
        bound = 1.0 / math.sqrt(fan_in)
        w = jax.random.uniform(kw, (fan_in, fan_out), jnp.float32, -bound, bound)
        b = jax.random.uniform(kb, (fan_out,), jnp.float32, -bound, bound)
        return w, b

    w1, b1 = lin(ks[0], ks[1], d_model, d2)
    w2, b2 = lin(ks[2], ks[3], d2, d_model)
    w3, b3 = lin(ks[4], ks[5], d_model, out_size)
    return (w1, b1, w2, b2, w3, b3)


def _reference(x, last_coords, params, compute_dtype=jnp.float32):
    """Pure-JAX reference; compute_dtype mirrors the kernel's MXU feed dtype."""
    w1, b1, w2, b2, w3, b3 = params
    c = compute_dtype
    h1 = jnp.dot(x.astype(c), w1.astype(c), preferred_element_type=jnp.float32)
    h1 = jnp.maximum(h1 + b1.astype(jnp.float32), 0.0)
    h2 = jnp.dot(h1.astype(c), w2.astype(c), preferred_element_type=jnp.float32)
    h2 = jnp.maximum(h2 + b2.astype(jnp.float32), 0.0)
    pred = jnp.dot(h2.astype(c), w3.astype(c), preferred_element_type=jnp.float32)
    pred = pred + b3.astype(jnp.float32)
    pred = pred.reshape(*pred.shape[:-1], -1, 2)
    return pred + last_coords


if __name__ == "__main__":
    key = jax.random.PRNGKey(0)
    kx, kc, kp = jax.random.split(key, 3)

    batch, seq, d_model, out_size = 2, 8, 32, 4
    x = jax.random.normal(kx, (batch, seq, d_model), jnp.float32)
    last_coords = jax.random.normal(
        kc, (batch, seq, out_size // 2, 2), jnp.float32)
    params = init_params(kp, d_model, out_size)

    coords = cascade_offset_generator(x, last_coords, params)
    coords = jax.block_until_ready(coords)

    ref_bf16 = _reference(x, last_coords, params, compute_dtype=jnp.bfloat16)
    ref_f32 = _reference(x, last_coords, params, compute_dtype=jnp.float32)

    assert coords.shape == (batch, seq, out_size // 2, 2), coords.shape
    assert jnp.allclose(coords, ref_bf16, atol=1e-3, rtol=1e-3), (
        float(jnp.max(jnp.abs(coords - ref_bf16))))
    assert jnp.allclose(coords, ref_f32, atol=5e-2, rtol=5e-2), (
        float(jnp.max(jnp.abs(coords - ref_f32))))

    print("KERNEL_OK")
</pallas_src>

<mosaic_0001>
module attributes {stable_mosaic.version = 11 : i64} {
  func.func @_mlp_offset_kernel(%arg0: i32, %arg1: memref<16x32xf32, #tpu.memory_space<vmem>>, %arg2: memref<16x4xf32, #tpu.memory_space<vmem>>, %arg3: memref<32x64xbf16, #tpu.memory_space<vmem>>, %arg4: memref<1x64xf32, #tpu.memory_space<vmem>>, %arg5: memref<64x32xbf16, #tpu.memory_space<vmem>>, %arg6: memref<1x32xf32, #tpu.memory_space<vmem>>, %arg7: memref<32x4xbf16, #tpu.memory_space<vmem>>, %arg8: memref<1x4xf32, #tpu.memory_space<vmem>>, %arg9: memref<16x4xf32, #tpu.memory_space<vmem>>) attributes {dimension_semantics = [#tpu.dimension_semantics<parallel>], iteration_bounds = array<i64: 1>, scalar_prefetch = 0 : i64, scratch_operands = 0 : i64, tpu.core_type = #tpu.core_type<tc>, window_params = [{transform_indices = @transform_0, window_bounds = array<i64: 16, 32>}, {transform_indices = @transform_1, window_bounds = array<i64: 16, 4>}, {pipeline_mode = #tpu.pipeline_mode<synchronous>, transform_indices = @transform_2, window_bounds = array<i64: 32, 64>}, {pipeline_mode = #tpu.pipeline_mode<synchronous>, transform_indices = @transform_3, window_bounds = array<i64: 1, 64>}, {pipeline_mode = #tpu.pipeline_mode<synchronous>, transform_indices = @transform_4, window_bounds = array<i64: 64, 32>}, {pipeline_mode = #tpu.pipeline_mode<synchronous>, transform_indices = @transform_5, window_bounds = array<i64: 1, 32>}, {pipeline_mode = #tpu.pipeline_mode<synchronous>, transform_indices = @transform_6, window_bounds = array<i64: 32, 4>}, {pipeline_mode = #tpu.pipeline_mode<synchronous>, transform_indices = @transform_7, window_bounds = array<i64: 1, 4>}, {transform_indices = @transform_8, window_bounds = array<i64: 16, 4>}]} {
    %c0 = arith.constant 0 : index
    %c0_0 = arith.constant 0 : index
    %0 = vector.load %arg1[%c0, %c0_0] : memref<16x32xf32, #tpu.memory_space<vmem>>, vector<16x32xf32>
    %1 = arith.truncf %0 : vector<16x32xf32> to vector<16x32xbf16>
    %c0_1 = arith.constant 0 : index
    %c0_2 = arith.constant 0 : index
    %2 = vector.load %arg3[%c0_1, %c0_2] : memref<32x64xbf16, #tpu.memory_space<vmem>>, vector<32x64xbf16>
    %cst = arith.constant dense<0.000000e+00> : vector<16x64xf32>
    %3 = tpu.matmul %1, %2, %cst {dimension_numbers = #tpu.dot_dimension_numbers<[1], [0], [0], [1], [0, 0, 1, 1], [], []>} : vector<16x32xbf16>, vector<32x64xbf16>, vector<16x64xf32> -> vector<16x64xf32>
    %c0_3 = arith.constant 0 : index
    %c0_4 = arith.constant 0 : index
    %4 = vector.load %arg4[%c0_3, %c0_4] : memref<1x64xf32, #tpu.memory_space<vmem>>, vector<1x64xf32>
    %5 = vector.broadcast %4 : vector<1x64xf32> to vector<16x64xf32>
    %6 = arith.addf %3, %5 : vector<16x64xf32>
    %cst_5 = arith.constant 0.000000e+00 : f32
    %7 = vector.broadcast %cst_5 : f32 to vector<16x64xf32>
    %8 = arith.maximumf %6, %7 : vector<16x64xf32>
    %9 = arith.truncf %8 : vector<16x64xf32> to vector<16x64xbf16>
    %c0_6 = arith.constant 0 : index
    %c0_7 = arith.constant 0 : index
    %10 = vector.load %arg5[%c0_6, %c0_7] : memref<64x32xbf16, #tpu.memory_space<vmem>>, vector<64x32xbf16>
    %cst_8 = arith.constant dense<0.000000e+00> : vector<16x32xf32>
    %11 = tpu.matmul %9, %10, %cst_8 {dimension_numbers = #tpu.dot_dimension_numbers<[1], [0], [0], [1], [0, 0, 1, 1], [], []>} : vector<16x64xbf16>, vector<64x32xbf16>, vector<16x32xf32> -> vector<16x32xf32>
    %c0_9 = arith.constant 0 : index
    %c0_10 = arith.constant 0 : index
    %12 = vector.load %arg6[%c0_9, %c0_10] : memref<1x32xf32, #tpu.memory_space<vmem>>, vector<1x32xf32>
    %13 = vector.broadcast %12 : vector<1x32xf32> to vector<16x32xf32>
    %14 = arith.addf %11, %13 : vector<16x32xf32>
    %cst_11 = arith.constant 0.000000e+00 : f32
    %15 = vector.broadcast %cst_11 : f32 to vector<16x32xf32>
    %16 = arith.maximumf %14, %15 : vector<16x32xf32>
    %17 = arith.truncf %16 : vector<16x32xf32> to vector<16x32xbf16>
    %c0_12 = arith.constant 0 : index
    %c0_13 = arith.constant 0 : index
    %18 = vector.load %arg7[%c0_12, %c0_13] : memref<32x4xbf16, #tpu.memory_space<vmem>>, vector<32x4xbf16>
    %cst_14 = arith.constant dense<0.000000e+00> : vector<16x4xf32>
    %19 = tpu.matmul %17, %18, %cst_14 {dimension_numbers = #tpu.dot_dimension_numbers<[1], [0], [0], [1], [0, 0, 1, 1], [], []>} : vector<16x32xbf16>, vector<32x4xbf16>, vector<16x4xf32> -> vector<16x4xf32>
    %c0_15 = arith.constant 0 : index
    %c0_16 = arith.constant 0 : index
    %20 = vector.load %arg8[%c0_15, %c0_16] : memref<1x4xf32, #tpu.memory_space<vmem>>, vector<1x4xf32>
    %21 = vector.broadcast %20 : vector<1x4xf32> to vector<16x4xf32>
    %22 = arith.addf %19, %21 : vector<16x4xf32>
    %c0_17 = arith.constant 0 : index
    %c0_18 = arith.constant 0 : index
    %23 = vector.load %arg2[%c0_17, %c0_18] : memref<16x4xf32, #tpu.memory_space<vmem>>, vector<16x4xf32>
    %24 = arith.addf %22, %23 : vector<16x4xf32>
    %c0_19 = arith.constant 0 : index
    %c0_20 = arith.constant 0 : index
    %25 = vector.load %arg9[%c0_19, %c0_20] : memref<16x4xf32, #tpu.memory_space<vmem>>, vector<16x4xf32>
    tpu.vector_store %arg9[%c0_19, %c0_20], %24 {strides = array<i32>} : memref<16x4xf32, #tpu.memory_space<vmem>>, vector<16x4xf32>,
    return
  }
  func.func @transform_0(%arg0: i32) -> (i32, i32) {
    %c0_i32 = arith.constant 0 : i32
    %c0_i32_0 = arith.constant 0 : i32
    return %arg0, %c0_i32 : i32, i32
  }
  func.func @transform_1(%arg0: i32) -> (i32, i32) {
    %c0_i32 = arith.constant 0 : i32
    %c0_i32_0 = arith.constant 0 : i32
    return %arg0, %c0_i32 : i32, i32
  }
  func.func @transform_2(%arg0: i32) -> (i32, i32) {
    %c0_i32 = arith.constant 0 : i32
    %c0_i32_0 = arith.constant 0 : i32
    %c0_i32_1 = arith.constant 0 : i32
    return %c0_i32, %c0_i32_0 : i32, i32
  }
  func.func @transform_3(%arg0: i32) -> (i32, i32) {
    %c0_i32 = arith.constant 0 : i32
    %c0_i32_0 = arith.constant 0 : i32
    %c0_i32_1 = arith.constant 0 : i32
    return %c0_i32, %c0_i32_0 : i32, i32
  }
  func.func @transform_4(%arg0: i32) -> (i32, i32) {
    %c0_i32 = arith.constant 0 : i32
    %c0_i32_0 = arith.constant 0 : i32
    %c0_i32_1 = arith.constant 0 : i32
    return %c0_i32, %c0_i32_0 : i32, i32
  }
  func.func @transform_5(%arg0: i32) -> (i32, i32) {
    %c0_i32 = arith.constant 0 : i32
    %c0_i32_0 = arith.constant 0 : i32
    %c0_i32_1 = arith.constant 0 : i32
    return %c0_i32, %c0_i32_0 : i32, i32
  }
  func.func @transform_6(%arg0: i32) -> (i32, i32) {
    %c0_i32 = arith.constant 0 : i32
    %c0_i32_0 = arith.constant 0 : i32
    %c0_i32_1 = arith.constant 0 : i32
    return %c0_i32, %c0_i32_0 : i32, i32
  }
  func.func @transform_7(%arg0: i32) -> (i32, i32) {
    %c0_i32 = arith.constant 0 : i32
    %c0_i32_0 = arith.constant 0 : i32
    %c0_i32_1 = arith.constant 0 : i32
    return %c0_i32, %c0_i32_0 : i32, i32
  }
  func.func @transform_8(%arg0: i32) -> (i32, i32) {
    %c0_i32 = arith.constant 0 : i32
    %c0_i32_0 = arith.constant 0 : i32
    return %arg0, %c0_i32 : i32, i32
  }
}

</mosaic_0001>

<bundles_post_ra>
// kernel: tpu_custom_call.1
= control target key start
LH: loop header
LB: loop body
LE: loop exit
PB: predicated region body
PF: predicated region fallthrough
CT: control target
= control target key end

     0   :  { %v332_v0 = vmov 0.0   ;;  %vm333_vm0 = vmmov 0   ;;  %vm56_vm1 = vcmask 261120   ;;  %vm143_vm2 = vcmask 523264   ;;  %s435_s2 = inlined_call_operand.vmem [shape: bf16[32,64], index: 2, kind: input, shape index: {}]   ;;  %s436_s0 = inlined_call_operand.vmem [shape: f32[16,32], index: 0, kind: input, shape index: {}]   ;;  %s437_s4 = inlined_call_operand.vmem [shape: bf16[64,32], index: 4, kind: input, shape index: {}]   ;;  %s438_s3 = inlined_call_operand.vmem [shape: f32[1,64], index: 3, kind: input, shape index: {}]   ;;  %s439_s6 = inlined_call_operand.vmem [shape: bf16[32,4], index: 6, kind: input, shape index: {}]   ;;  %s440_s5 = inlined_call_operand.vmem [shape: f32[1,32], index: 5, kind: input, shape index: {}]   ;;  %s441_s7 = inlined_call_operand.vmem [shape: f32[1,4], index: 7, kind: input, shape index: {}]   ;;  %s442_s1 = inlined_call_operand.vmem [shape: f32[16,4], index: 1, kind: input, shape index: {}]   ;;  %s443_s8 = inlined_call_operand.vmem [shape: f32[16,4], index: 8, kind: output, shape index: {}]  }
   0x1   :  { %294 = vmatprep.subr.bf16.mxu0 %v332_v0  ;;  %v324_v1 = vld [vmem:[%s435_s2 + $0x8] sm:$0xff]   ;;  %298 = vmatprep.mubr.msk.bf16.mxu0 %vm333_vm0, %v332_v0  ;;  %v325_v2 = vld [vmem:[%s435_s2] sm:$0xff]   ;;  %v326_v5 = vld [vmem:[%s437_s4 + $0x18] sm:$0xff]   ;;  %vm262_vm3 = vcmask 31744  }
   0x2   :  { %302 = vmatprep.subr.bf16.mxu1 %v332_v0  ;;  %310 = vmatprep.mubr.msk.bf16.mxu1 %vm333_vm0, %v332_v0  ;;  %v30_v3 = vld [vmem:[%s436_s0] sm:$0xff]  ;;  %v31_v4 = vld [vmem:[%s436_s0 + $0x8] sm:$0xff]  ;;  %v327_v7 = vld [vmem:[%s437_s4 + $0x10] sm:$0xff]  }
   0x3   :  { %295 = vmatpush3.bf16.msra.mxu0 %v324_v1  ;;  %v32_v6 = vpack.c.bf16 %v31_v4, %v30_v3  ;;  %303 = vmatpush3.bf16.msra.mxu1 %v326_v5  ;;  %v328_v8 = vld [vmem:[%s437_s4 + $0x8] sm:$0xff]   ;;  %v329_v9 = vld [vmem:[%s437_s4] sm:$0xff]  }
   0x4   :  { %296 = vmatprep.subr.bf16.mxu0 %v332_v0  ;;  %304 = vmatprep.subr.bf16.mxu1 %v332_v0  ;;  %v269_v10 = vld [vmem:[%s438_s3] ss:$0 sm:$0xff]  ;;  %v330_v20 = vld [vmem:[%s439_s6 + $0x8] sm:$0xff]  }
   0x5   :  { %v331_v21 = vld [vmem:[%s439_s6] sm:$0xff]   ;;  %v259_v39 = vld [vmem:[%s442_s1 + $0x8] sm:$0xff] }
   0x6   :  { %v273_v22 = vld [vmem:[%s440_s5] ss:$0 sm:$0xff] }
   0x7   :  { %297 = vmatpush3.bf16.msra.mxu0 %v325_v2  ;;  %305 = vmatpush3.bf16.msra.mxu1 %v327_v7  ;;  %v279_v32 = vld [vmem:[%s441_s7] ss:$0 sm:$0xff] }
   0x8   :  { %314 = vmatprep.subr.bf16.mxu0 %v332_v0  ;;  %306 = vmatprep.subr.bf16.mxu1 %v332_v0  ;;  %v258_v34 = vld [vmem:[%s442_s1] sm:$0xff] }
   0xa   :  { %299 = vmatmul.mubr.msk.bf16.vlgmr.msra.gmra.mxu0 %vm56_vm1, %v32_v6 }
   0xb   :  { %318 = vmatprep.mubr.msk.bf16.mxu0 %vm333_vm0, %v332_v0  ;;  %307 = vmatpush3.bf16.msra.mxu1 %v328_v8 }
   0xc   :  { %308 = vmatprep.subr.bf16.mxu1 %v332_v0  ;;  %315 = vmatpush3.bf16.msra.mxu0 %v330_v20 }
   0xd   :  { %316 = vmatprep.subr.bf16.mxu0 %v332_v0 }
   0xf   :  { %309 = vmatpush3.bf16.msra.mxu1 %v329_v9 }
  0x10   :  { %317 = vmatpush3.bf16.msra.mxu0 %v331_v21 }
  0xca   :  { %v94_v11 = vpop.f32.mrf.mxu0 }
  0xcb   :  { %v95_v13 = vadd.f32 %v269_v10, %v94_v11 }
  0xcc   :  { %v300_v12 = vpop.f32.mrf.mxu0 }
  0xcd   :  { %v101_v17 = vmax.f32 %v95_v13, 0.0 }
  0xce   :  { %v97_v14 = vpop.f32.mrf.mxu0 }
  0xcf   :  { %v98_v15 = vadd.f32 %v269_v10, %v97_v14 }
  0xd0   :  { %v301_v16 = vpop.f32.mrf.mxu0 }
  0xd1   :  { %v102_v18 = vmax.f32 %v98_v15, 0.0 }
  0xd3   :  { %v103_v19 = vpack.c.bf16 %v102_v18, %v101_v17 }
  0xd5   :  { %311 = vmatmul.mubr.msk.bf16.vlgmr.msra.gmra.mxu1 %vm143_vm2, %v103_v19 }
 0x195   :  { %v181_v23 = vpop.f32.mrf.mxu1 }
 0x196   :  { %v182_v25 = vadd.f32 %v273_v22, %v181_v23 }
 0x197   :  { %v312_v24 = vpop.f32.mrf.mxu1 }
 0x198   :  { %v188_v29 = vmax.f32 %v182_v25, 0.0 }
 0x199   :  { %v184_v26 = vpop.f32.mrf.mxu1 }
 0x19a   :  { %v185_v27 = vadd.f32 %v273_v22, %v184_v26 }
 0x19b   :  { %v313_v28 = vpop.f32.mrf.mxu1 }
 0x19c   :  { %v189_v30 = vmax.f32 %v185_v27, 0.0 }
 0x19e   :  { %v190_v31 = vpack.c.bf16 %v189_v30, %v188_v29 }
 0x1a0   :  { %319 = vmatmul.mubr.msk.bf16.vlgmr.msra.gmra.mxu0 %vm56_vm1, %v190_v31 }
 0x260   :  { %v251_v33 = vpop.f32.mrf.mxu0 }
 0x261   :  { %v252_v35 = vadd.f32 %v279_v32, %v251_v33 }
 0x262   :  { %v320_v36 = vpop.f32.mrf.mxu0 }
 0x263   :  { %v260_v37 = vadd.f32 %v258_v34, %v252_v35 }
 0x264   :  { %v254_v38 = vpop.f32.mrf.mxu0 }
 0x265   :  { %263 = vst.msk [vmem:[%s443_s8] sm:$0xff] %vm262_vm3, %v260_v37  ;;  %v255_v40 = vadd.f32 %v279_v32, %v254_v38 }
 0x266   :  { %v321_v41 = vpop.f32.mrf.mxu0 }
 0x267   :  { %v261_v42 = vadd.f32 %v259_v39, %v255_v40 }
 0x269   :  { %264 = vst.msk [vmem:[%s443_s8 + $0x8] sm:$0xff] %vm262_vm3, %v261_v42 }

</bundles_post_ra>
